<compile_context>
chip_gen: v5e
topology: v5e:2x2
jax: 0.10.0
libtpu: 0.0.40
codegen_flags: <defaults>
</compile_context>

<pallas_src>
import functools

import jax
import jax.numpy as jnp
from jax.experimental import pallas as pl
from jax.experimental.pallas import tpu as pltpu

EPS = 1e-5  # torch.nn.LayerNorm default


def _round_up(v, m):
    return (v + m - 1) // m * m


def _tpu_budget():
    """(vmem_capacity_bytes, tensorcores_per_chip) with safe fallbacks."""
    vmem_cap = 64 << 20              # conservative default (v7x per-TC VMEM)
    try:
        vmem_cap = int(pltpu.get_tpu_info().vmem_capacity_bytes)
    except Exception:
        pass
    num_tc = 1
    try:
        if "v7" in jax.devices()[0].device_kind.lower():
            num_tc = 2               # v7x: 2 TensorCores per chip
    except Exception:
        pass
    return vmem_cap, num_tc


def variance_predictor_kernel(
    x_ref,       # (Hp, Nb)     compute dtype, channels-first padded slab
    w1f_ref,     # (Fp, 3*Hp)   compute dtype, conv1 taps fused along K
    b1_ref,      # (Fp, 1) f32
    g1_ref,      # (Fp, 1) f32
    bt1_ref,     # (Fp, 1) f32
    w2f_ref,     # (Fp, 3*Fp)   compute dtype, conv2 taps fused along K
    b2_ref,      # (Fp, 1) f32
    gw_ref,      # (Fp, 1) f32  = gamma2 * wl  (LN2 affine folded into linear)
    cmask_ref,   # (1, Nb) f32, 1.0 on real time columns
    consts_ref,  # (1, 2)  f32 SMEM: [sum(beta2*wl) + bl, sum(gamma2*wl)]
    o_ref,       # (1, Nb) f32
    *, f_real,
):
    x = x_ref[...]
    n = x.shape[1]
    inv_f = jnp.float32(1.0 / f_real)
    cmask = cmask_ref[...]

    # ---- conv1d_1 (k=3, 'same') as ONE MXU matmul over 3 lane-shifted copies
    #      stacked along the contraction axis (dropout_1 = identity) ----------
    # Correctness of the lane rolls relies on Tpad >= T + 2*pad (asserted in
    # the wrapper): real output columns never read across element boundaries.
    xs = jnp.concatenate(
        [pltpu.roll(x, 1, axis=1), x, pltpu.roll(x, n - 1, axis=1)], axis=0)
    h = jnp.dot(w1f_ref[...], xs, preferred_element_type=jnp.float32) + b1_ref[...]
    h = jnp.maximum(h, 0.0)

    # ---- LayerNorm over channels (sublane axis). Padded channel rows of h
    #      are exact zeros, so plain sums / f_real give correct statistics. ---
    mean = jnp.sum(h, axis=0, keepdims=True) * inv_f
    var = jnp.maximum(
        jnp.sum(h * h, axis=0, keepdims=True) * inv_f - mean * mean, 0.0)
    h = (h - mean) * jax.lax.rsqrt(var + jnp.float32(EPS)) * g1_ref[...] + bt1_ref[...]

    # Re-zero the per-element padding columns (conv2's halo reads must see
    # exact zeros) and cast the matmul operand back to the compute dtype.
    h = (h * cmask).astype(x.dtype)

    # ---- conv1d_2 (k=3, pad=1), fused the same way, + ReLU ------------------
    hs = jnp.concatenate(
        [pltpu.roll(h, 1, axis=1), h, pltpu.roll(h, n - 1, axis=1)], axis=0)
    h2 = jnp.dot(w2f_ref[...], hs, preferred_element_type=jnp.float32) + b2_ref[...]
    h2 = jnp.maximum(h2, 0.0)

    # ---- LayerNorm_2 with its affine FOLDED into the final F->1 projection:
    #        y = rstd * (sum_c h2_c*gw_c - mean * sum_c gw_c) + const
    #      gw = gamma2*wl,  const = sum_c beta2_c*wl_c + bl  ------------------
    m2 = jnp.sum(h2, axis=0, keepdims=True) * inv_f
    v2 = jnp.maximum(
        jnp.sum(h2 * h2, axis=0, keepdims=True) * inv_f - m2 * m2, 0.0)
    rstd2 = jax.lax.rsqrt(v2 + jnp.float32(EPS))
    proj = jnp.sum(h2 * gw_ref[...], axis=0, keepdims=True)
    y = rstd2 * (proj - m2 * consts_ref[0, 1]) + consts_ref[0, 0]
    o_ref[...] = y.astype(o_ref.dtype)


def variance_predictor(x, params, mask, *, compute_dtype=jnp.bfloat16):
    """x: (B, T, H) f32; mask: (B, T) bool (True = padded). Returns (B, T) f32."""
    B, T, H = x.shape
    k, H_w, F = params["w1"].shape
    assert H_w == H
    # The PyTorch module hardcodes padding=1 on conv1d_2, so sequence length is
    # only preserved for kernel_size == 3 (the configuration this kernel targets).
    assert k == 3, "VariancePredictor Pallas kernel assumes kernel_size == 3"
    p = (k - 1) // 2                      # == 1 == conv2 padding

    itm = jnp.dtype(compute_dtype).itemsize
    CSUB = 16                             # sublane pack granule (f32: 8, bf16: 16)
    Hp = _round_up(H, CSUB)               # channels padded only to the granule
    Fp = _round_up(F, CSUB)
    Tpad = _round_up(T + 2 * p, 128)      # per-element padded slab length
    assert Tpad >= T + 2 * p              # halo columns exist inside each element

    # ---- per-generation working-set sizing ----------------------------------
    vmem_cap, num_tc = _tpu_budget()
    if vmem_cap >= 100 * (1 << 20):       # v5e / v6e: 128 MiB physical VMEM
        ws_budget, vmem_ceiling = 80 << 20, 100 << 20
    else:                                  # v7x: 64 MiB per TensorCore
        ws_budget, vmem_ceiling = 36 << 20, 52 << 20

    # Approx. live bytes per lane column: double-buffered x block, the two
    # stacked matmul operands, f32 intermediates, cast copy, cmask/out rows.
    bytes_per_col = (2 * Hp * itm + 3 * Hp * itm + 3 * Fp * itm
                     + Fp * itm + 4 * Fp * 4 + 24)
    max_cols = max(Tpad, (ws_budget // bytes_per_col) // 128 * 128)

    bb = max(1, min(B, max_cols // Tpad))  # batch elements fused per grid step
    if num_tc > 1 and B >= num_tc:
        # v7x: keep >= num_tc parallel grid steps so every TensorCore gets work.
        bb = min(bb, max(1, B // num_tc))
    Bp = _round_up(B, bb)                  # pad batch: no prime-B divisor cliff
    grid = (Bp // bb,)
    Nb = bb * Tpad
    Nfull = Bp * Tpad
    # TODO(synk): for a single extremely long sequence (Tpad*bytes_per_col near
    # the VMEM budget) add a T-tile grid axis with a halo of `p` columns.

    # ---- wrapper-side layout plumbing (one-time, HBM side) -------------------
    # TODO(synk): fuse this transpose/pad into the upstream producer under the
    # same jit (it is a full HBM pass that can rival the kernel cost).
    xt = jnp.transpose(x, (2, 0, 1))                              # (H, B, T)
    xt = jnp.pad(xt, ((0, Hp - H), (0, Bp - B), (p, Tpad - T - p)))
    x_prep = xt.reshape(Hp, Nfull).astype(compute_dtype)          # (Hp, Bp*Tpad)

    def prep_wf(w, cin, cin_p, cout, cout_p):
        # (k, Cin, Cout) -> (Cout_p, k*Cin_p): taps concatenated along K, in the
        # same order as the in-kernel stacked operand [x(t-1); x(t); x(t+1)].
        wt = jnp.transpose(w, (2, 0, 1)).astype(jnp.float32)      # (Cout, k, Cin)
        wt = jnp.pad(wt, ((0, cout_p - cout), (0, 0), (0, cin_p - cin)))
        return wt.reshape(cout_p, k * cin_p).astype(compute_dtype)

    w1f = prep_wf(params["w1"], H, Hp, F, Fp)                     # (Fp, 3*Hp)
    w2f = prep_wf(params["w2"], F, Fp, F, Fp)                     # (Fp, 3*Fp)

    def col(v):  # -> (Fp, 1) f32, zero-padded rows
        c = jnp.asarray(v, jnp.float32).reshape(-1, 1)
        return jnp.pad(c, ((0, Fp - c.shape[0]), (0, 0)))

    wl = jnp.asarray(params["wl"], jnp.float32).reshape(-1)       # (F,)
    g2 = jnp.asarray(params["g2"], jnp.float32).reshape(-1)
    bt2 = jnp.asarray(params["beta2"], jnp.float32).reshape(-1)
    bl = jnp.asarray(params["bl"], jnp.float32).reshape(())

    b1c, g1c, bt1c = col(params["b1"]), col(params["g1"]), col(params["beta1"])
    b2c = col(params["b2"])
    gwc = col(g2 * wl)                                            # LN2 affine fold
    consts = jnp.stack([jnp.sum(bt2 * wl) + bl,                   # const term
                        jnp.sum(g2 * wl)]).reshape(1, 2).astype(jnp.float32)

    s = jnp.arange(Tpad)
    colmask = ((s >= p) & (s < p + T)).astype(jnp.float32)
    colmask = jnp.tile(colmask, (Bp,)).reshape(1, Nfull)          # real-column mask

    # ---- explicit VMEM budget ------------------------------------------------
    weight_bytes = (Fp * 3 * Hp + Fp * 3 * Fp) * itm + 6 * Fp * 4
    io_bytes = 2 * (Hp * Nb * itm + 2 * Nb * 4) + 2 * weight_bytes
    interm_bytes = (3 * Hp + 4 * Fp) * Nb * itm + 5 * Fp * Nb * 4
    vmem_limit = int(min(vmem_ceiling,
                         max(32 << 20, io_bytes + interm_bytes + (4 << 20))))

    full = lambda a: pl.BlockSpec(a.shape, lambda b: (0,) * a.ndim)

    out = pl.pallas_call(
        functools.partial(variance_predictor_kernel, f_real=F),
        out_shape=jax.ShapeDtypeStruct((1, Nfull), jnp.float32),
        grid_spec=pltpu.PrefetchScalarGridSpec(
            num_scalar_prefetch=0,
            grid=grid,
            in_specs=[
                pl.BlockSpec((Hp, Nb), lambda b: (0, b)),            # x slab
                full(w1f), full(b1c), full(g1c), full(bt1c),
                full(w2f), full(b2c), full(gwc),
                pl.BlockSpec((1, Nb), lambda b: (0, b)),             # column mask
                pl.BlockSpec(memory_space=pltpu.MemorySpace.SMEM),   # consts
            ],
            out_specs=pl.BlockSpec((1, Nb), lambda b: (0, b)),       # lane-dense row
        ),
        compiler_params=pltpu.CompilerParams(
            dimension_semantics=("parallel",),
            vmem_limit_bytes=vmem_limit,
        ),
    )(
        x_prep,
        w1f, b1c, g1c, bt1c,
        w2f, b2c, gwc,
        colmask, consts,
    )

    # Extract the real time columns and apply masked_fill(mask, 0.0).
    y = out.reshape(Bp, Tpad)[:B, p:p + T]
    return jnp.where(mask, 0.0, y)


def reference(x, params, mask):
    """Plain-JAX reference of the same forward pass (for a sanity check)."""
    def conv(h, w, b, pad):
        k = w.shape[0]
        hp = jnp.pad(h, ((0, 0), (pad, pad), (0, 0)))
        L = h.shape[1] + 2 * pad - k + 1
        acc = jnp.zeros((h.shape[0], L, w.shape[2]), jnp.float32)
        for j in range(k):
            acc = acc + jnp.einsum("btc,cf->btf", hp[:, j:j + L, :], w[j])
        return acc + b

    def ln(h, g, be):
        mu = jnp.mean(h, -1, keepdims=True)
        var = jnp.mean((h - mu) ** 2, -1, keepdims=True)
        return (h - mu) / jnp.sqrt(var + EPS) * g + be

    h = conv(x, params["w1"], params["b1"][0], (params["w1"].shape[0] - 1) // 2)
    h = ln(jnp.maximum(h, 0.0), params["g1"][0], params["beta1"][0])
    h = conv(h, params["w2"], params["b2"][0], 1)
    h = ln(jnp.maximum(h, 0.0), params["g2"][0], params["beta2"][0])
    y = jnp.einsum("btf,fo->bto", h, params["wl"])[..., 0] + params["bl"][0, 0]
    return jnp.where(mask, 0.0, y)


if __name__ == "__main__":
    # model_config -> encoder_hidden=32, filter_size=32, kernel_size=3
    B, T, H, F, K = 2, 8, 32, 32, 3

    key = jax.random.PRNGKey(0)
    keys = jax.random.split(key, 8)

    # Deterministic synthetic parameters (shapes match the PyTorch module).
    params = {
        "w1": jax.random.normal(keys[0], (K, H, F), jnp.float32) * 0.1,   # conv1d_1 weight
        "b1": jax.random.normal(keys[1], (1, F), jnp.float32) * 0.1,
        "g1": jnp.ones((1, F), jnp.float32),                              # layer_norm_1
        "beta1": jnp.zeros((1, F), jnp.float32),
        "w2": jax.random.normal(keys[2], (K, F, F), jnp.float32) * 0.1,   # conv1d_2 weight
        "b2": jax.random.normal(keys[3], (1, F), jnp.float32) * 0.1,
        "g2": jnp.ones((1, F), jnp.float32),                              # layer_norm_2
        "beta2": jnp.zeros((1, F), jnp.float32),
        "wl": jax.random.normal(keys[4], (F, 1), jnp.float32) * 0.1,      # linear_layer
        "bl": jax.random.normal(keys[5], (1, 1), jnp.float32) * 0.1,
    }

    x = jax.random.normal(keys[6], (B, T, H), jnp.float32)
    # mask: True = padded position (gets filled with 0.0)
    mask = jnp.arange(T)[None, :] >= jnp.array([T, T - 3])[:, None]       # (B, T) bool

    ref = reference(x, params, mask)

    # f32 path: exact-ish check of the kernel math / layout.
    out32 = variance_predictor(x, params, mask, compute_dtype=jnp.float32)
    jax.block_until_ready(out32)
    assert out32.shape == (B, T)
    assert jnp.allclose(out32, ref, atol=1e-4, rtol=1e-4), (out32, ref)

    # bf16-matmul path (default, v6e/v7x-friendly): looser tolerance.
    out16 = variance_predictor(x, params, mask)
    jax.block_until_ready(out16)
    assert out16.shape == (B, T)
    assert jnp.allclose(out16, ref, atol=5e-2, rtol=5e-2), (out16, ref)

    print("KERNEL_OK")
</pallas_src>

<mosaic_0001>
module attributes {stable_mosaic.version = 11 : i64} {
  func.func @variance_predictor_kernel(%arg0: i32, %arg1: memref<32x256xf32, #tpu.memory_space<vmem>>, %arg2: memref<32x96xf32, #tpu.memory_space<vmem>>, %arg3: memref<32x1xf32, #tpu.memory_space<vmem>>, %arg4: memref<32x1xf32, #tpu.memory_space<vmem>>, %arg5: memref<32x1xf32, #tpu.memory_space<vmem>>, %arg6: memref<32x96xf32, #tpu.memory_space<vmem>>, %arg7: memref<32x1xf32, #tpu.memory_space<vmem>>, %arg8: memref<32x1xf32, #tpu.memory_space<vmem>>, %arg9: memref<1x256xf32, #tpu.memory_space<vmem>>, %arg10: memref<1x2xf32, #tpu.memory_space<smem>>, %arg11: memref<1x256xf32, #tpu.memory_space<vmem>>) attributes {dimension_semantics = [#tpu.dimension_semantics<parallel>], iteration_bounds = array<i64: 1>, scalar_prefetch = 0 : i64, scratch_operands = 0 : i64, tpu.core_type = #tpu.core_type<tc>, window_params = [{transform_indices = @transform_0, window_bounds = array<i64: 32, 256>}, {pipeline_mode = #tpu.pipeline_mode<synchronous>, transform_indices = @transform_1, window_bounds = array<i64: 32, 96>}, {pipeline_mode = #tpu.pipeline_mode<synchronous>, transform_indices = @transform_2, window_bounds = array<i64: 32, 1>}, {pipeline_mode = #tpu.pipeline_mode<synchronous>, transform_indices = @transform_3, window_bounds = array<i64: 32, 1>}, {pipeline_mode = #tpu.pipeline_mode<synchronous>, transform_indices = @transform_4, window_bounds = array<i64: 32, 1>}, {pipeline_mode = #tpu.pipeline_mode<synchronous>, transform_indices = @transform_5, window_bounds = array<i64: 32, 96>}, {pipeline_mode = #tpu.pipeline_mode<synchronous>, transform_indices = @transform_6, window_bounds = array<i64: 32, 1>}, {pipeline_mode = #tpu.pipeline_mode<synchronous>, transform_indices = @transform_7, window_bounds = array<i64: 32, 1>}, {transform_indices = @transform_8, window_bounds = array<i64: 1, 256>}, {transform_indices = @transform_9, window_bounds = array<i64: 1, 2>}, {transform_indices = @transform_10, window_bounds = array<i64: 1, 256>}]} {
    %c0 = arith.constant 0 : index
    %c0_0 = arith.constant 0 : index
    %0 = vector.load %arg1[%c0, %c0_0] : memref<32x256xf32, #tpu.memory_space<vmem>>, vector<32x256xf32>
    %c0_1 = arith.constant 0 : index
    %c0_2 = arith.constant 0 : index
    %1 = vector.load %arg9[%c0_1, %c0_2] : memref<1x256xf32, #tpu.memory_space<vmem>>, vector<1x256xf32>
    %c1_i32 = arith.constant 1 : i32
    %2 = tpu.dynamic_rotate %0 by %c1_i32 dim 1 : vector<32x256xf32>, i32 -> vector<32x256xf32>
    %c255_i32 = arith.constant 255 : i32
    %3 = tpu.dynamic_rotate %0 by %c255_i32 dim 1 : vector<32x256xf32>, i32 -> vector<32x256xf32>
    %4 = tpu.concatenate %2, %0, %3 in 0 : vector<32x256xf32>, vector<32x256xf32>, vector<32x256xf32> -> vector<96x256xf32>
    %c0_3 = arith.constant 0 : index
    %c0_4 = arith.constant 0 : index
    %5 = vector.load %arg2[%c0_3, %c0_4] : memref<32x96xf32, #tpu.memory_space<vmem>>, vector<32x96xf32>
    %cst = arith.constant dense<0.000000e+00> : vector<32x256xf32>
    %6 = tpu.matmul %5, %4, %cst {dimension_numbers = #tpu.dot_dimension_numbers<[1], [0], [0], [1], [0, 0, 1, 1], [], []>} : vector<32x96xf32>, vector<96x256xf32>, vector<32x256xf32> -> vector<32x256xf32>
    %c0_5 = arith.constant 0 : index
    %c0_6 = arith.constant 0 : index
    %7 = vector.load %arg3[%c0_5, %c0_6] : memref<32x1xf32, #tpu.memory_space<vmem>>, vector<32x1xf32>
    %8 = vector.broadcast %7 : vector<32x1xf32> to vector<32x256xf32>
    %9 = arith.addf %6, %8 : vector<32x256xf32>
    %cst_7 = arith.constant 0.000000e+00 : f32
    %10 = vector.broadcast %cst_7 : f32 to vector<32x256xf32>
    %11 = arith.maximumf %9, %10 : vector<32x256xf32>
    %cst_8 = arith.constant dense<0.000000e+00> : vector<256xf32>
    %12 = vector.multi_reduction <add>, %11, %cst_8 [0] : vector<32x256xf32> to vector<256xf32>
    %13 = vector.shape_cast %12 : vector<256xf32> to vector<1x256xf32>
    %cst_9 = arith.constant 3.125000e-02 : f32
    %14 = vector.broadcast %cst_9 : f32 to vector<1x256xf32>
    %15 = arith.mulf %13, %14 : vector<1x256xf32>
    %16 = arith.mulf %11, %11 : vector<32x256xf32>
    %cst_10 = arith.constant dense<0.000000e+00> : vector<256xf32>
    %17 = vector.multi_reduction <add>, %16, %cst_10 [0] : vector<32x256xf32> to vector<256xf32>
    %18 = vector.shape_cast %17 : vector<256xf32> to vector<1x256xf32>
    %cst_11 = arith.constant 3.125000e-02 : f32
    %19 = vector.broadcast %cst_11 : f32 to vector<1x256xf32>
    %20 = arith.mulf %18, %19 : vector<1x256xf32>
    %21 = arith.mulf %15, %15 : vector<1x256xf32>
    %22 = arith.subf %20, %21 : vector<1x256xf32>
    %cst_12 = arith.constant 0.000000e+00 : f32
    %23 = vector.broadcast %cst_12 : f32 to vector<1x256xf32>
    %24 = arith.maximumf %22, %23 : vector<1x256xf32>
    %25 = vector.broadcast %15 : vector<1x256xf32> to vector<32x256xf32>
    %26 = arith.subf %11, %25 : vector<32x256xf32>
    %cst_13 = arith.constant 9.99999974E-6 : f32
    %27 = vector.broadcast %cst_13 : f32 to vector<1x256xf32>
    %28 = arith.addf %24, %27 : vector<1x256xf32>
    %29 = math.rsqrt %28 : vector<1x256xf32>
    %30 = vector.broadcast %29 : vector<1x256xf32> to vector<32x256xf32>
    %31 = arith.mulf %26, %30 : vector<32x256xf32>
    %c0_14 = arith.constant 0 : index
    %c0_15 = arith.constant 0 : index
    %32 = vector.load %arg4[%c0_14, %c0_15] : memref<32x1xf32, #tpu.memory_space<vmem>>, vector<32x1xf32>
    %33 = vector.broadcast %32 : vector<32x1xf32> to vector<32x256xf32>
    %34 = arith.mulf %31, %33 : vector<32x256xf32>
    %c0_16 = arith.constant 0 : index
    %c0_17 = arith.constant 0 : index
    %35 = vector.load %arg5[%c0_16, %c0_17] : memref<32x1xf32, #tpu.memory_space<vmem>>, vector<32x1xf32>
    %36 = vector.broadcast %35 : vector<32x1xf32> to vector<32x256xf32>
    %37 = arith.addf %34, %36 : vector<32x256xf32>
    %38 = vector.broadcast %1 : vector<1x256xf32> to vector<32x256xf32>
    %39 = arith.mulf %37, %38 : vector<32x256xf32>
    %c1_i32_18 = arith.constant 1 : i32
    %40 = tpu.dynamic_rotate %39 by %c1_i32_18 dim 1 : vector<32x256xf32>, i32 -> vector<32x256xf32>
    %c255_i32_19 = arith.constant 255 : i32
    %41 = tpu.dynamic_rotate %39 by %c255_i32_19 dim 1 : vector<32x256xf32>, i32 -> vector<32x256xf32>
    %42 = tpu.concatenate %40, %39, %41 in 0 : vector<32x256xf32>, vector<32x256xf32>, vector<32x256xf32> -> vector<96x256xf32>
    %c0_20 = arith.constant 0 : index
    %c0_21 = arith.constant 0 : index
    %43 = vector.load %arg6[%c0_20, %c0_21] : memref<32x96xf32, #tpu.memory_space<vmem>>, vector<32x96xf32>
    %cst_22 = arith.constant dense<0.000000e+00> : vector<32x256xf32>
    %44 = tpu.matmul %43, %42, %cst_22 {dimension_numbers = #tpu.dot_dimension_numbers<[1], [0], [0], [1], [0, 0, 1, 1], [], []>} : vector<32x96xf32>, vector<96x256xf32>, vector<32x256xf32> -> vector<32x256xf32>
    %c0_23 = arith.constant 0 : index
    %c0_24 = arith.constant 0 : index
    %45 = vector.load %arg7[%c0_23, %c0_24] : memref<32x1xf32, #tpu.memory_space<vmem>>, vector<32x1xf32>
    %46 = vector.broadcast %45 : vector<32x1xf32> to vector<32x256xf32>
    %47 = arith.addf %44, %46 : vector<32x256xf32>
    %cst_25 = arith.constant 0.000000e+00 : f32
    %48 = vector.broadcast %cst_25 : f32 to vector<32x256xf32>
    %49 = arith.maximumf %47, %48 : vector<32x256xf32>
    %cst_26 = arith.constant dense<0.000000e+00> : vector<256xf32>
    %50 = vector.multi_reduction <add>, %49, %cst_26 [0] : vector<32x256xf32> to vector<256xf32>
    %51 = vector.shape_cast %50 : vector<256xf32> to vector<1x256xf32>
    %cst_27 = arith.constant 3.125000e-02 : f32
    %52 = vector.broadcast %cst_27 : f32 to vector<1x256xf32>
    %53 = arith.mulf %51, %52 : vector<1x256xf32>
    %54 = arith.mulf %49, %49 : vector<32x256xf32>
    %cst_28 = arith.constant dense<0.000000e+00> : vector<256xf32>
    %55 = vector.multi_reduction <add>, %54, %cst_28 [0] : vector<32x256xf32> to vector<256xf32>
    %56 = vector.shape_cast %55 : vector<256xf32> to vector<1x256xf32>
    %cst_29 = arith.constant 3.125000e-02 : f32
    %57 = vector.broadcast %cst_29 : f32 to vector<1x256xf32>
    %58 = arith.mulf %56, %57 : vector<1x256xf32>
    %59 = arith.mulf %53, %53 : vector<1x256xf32>
    %60 = arith.subf %58, %59 : vector<1x256xf32>
    %cst_30 = arith.constant 0.000000e+00 : f32
    %61 = vector.broadcast %cst_30 : f32 to vector<1x256xf32>
    %62 = arith.maximumf %60, %61 : vector<1x256xf32>
    %cst_31 = arith.constant 9.99999974E-6 : f32
    %63 = vector.broadcast %cst_31 : f32 to vector<1x256xf32>
    %64 = arith.addf %62, %63 : vector<1x256xf32>
    %65 = math.rsqrt %64 : vector<1x256xf32>
    %c0_32 = arith.constant 0 : index
    %c0_33 = arith.constant 0 : index
    %66 = vector.load %arg8[%c0_32, %c0_33] : memref<32x1xf32, #tpu.memory_space<vmem>>, vector<32x1xf32>
    %67 = vector.broadcast %66 : vector<32x1xf32> to vector<32x256xf32>
    %68 = arith.mulf %49, %67 : vector<32x256xf32>
    %cst_34 = arith.constant dense<0.000000e+00> : vector<256xf32>
    %69 = vector.multi_reduction <add>, %68, %cst_34 [0] : vector<32x256xf32> to vector<256xf32>
    %70 = vector.shape_cast %69 : vector<256xf32> to vector<1x256xf32>
    %c0_35 = arith.constant 0 : index
    %c1 = arith.constant 1 : index
    %71 = memref.load %arg10[%c0_35, %c1] : memref<1x2xf32, #tpu.memory_space<smem>>
    %72 = vector.broadcast %71 : f32 to vector<1x256xf32>
    %73 = arith.mulf %53, %72 : vector<1x256xf32>
    %74 = arith.subf %70, %73 : vector<1x256xf32>
    %75 = arith.mulf %65, %74 : vector<1x256xf32>
    %c0_36 = arith.constant 0 : index
    %c0_37 = arith.constant 0 : index
    %76 = memref.load %arg10[%c0_36, %c0_37] : memref<1x2xf32, #tpu.memory_space<smem>>
    %77 = vector.broadcast %76 : f32 to vector<1x256xf32>
    %78 = arith.addf %75, %77 : vector<1x256xf32>
    %c0_38 = arith.constant 0 : index
    %c0_39 = arith.constant 0 : index
    %79 = vector.load %arg11[%c0_38, %c0_39] : memref<1x256xf32, #tpu.memory_space<vmem>>, vector<1x256xf32>
    tpu.vector_store %arg11[%c0_38, %c0_39], %78 {strides = array<i32>} : memref<1x256xf32, #tpu.memory_space<vmem>>, vector<1x256xf32>,
    return
  }
  func.func @transform_0(%arg0: i32) -> (i32, i32) {
    %c0_i32 = arith.constant 0 : i32
    %c0_i32_0 = arith.constant 0 : i32
    return %c0_i32, %arg0 : i32, i32
  }
  func.func @transform_1(%arg0: i32) -> (i32, i32) {
    %c0_i32 = arith.constant 0 : i32
    %c0_i32_0 = arith.constant 0 : i32
    %c0_i32_1 = arith.constant 0 : i32
    return %c0_i32, %c0_i32_0 : i32, i32
  }
  func.func @transform_2(%arg0: i32) -> (i32, i32) {
    %c0_i32 = arith.constant 0 : i32
    %c0_i32_0 = arith.constant 0 : i32
    %c0_i32_1 = arith.constant 0 : i32
    return %c0_i32, %c0_i32_0 : i32, i32
  }
  func.func @transform_3(%arg0: i32) -> (i32, i32) {
    %c0_i32 = arith.constant 0 : i32
    %c0_i32_0 = arith.constant 0 : i32
    %c0_i32_1 = arith.constant 0 : i32
    return %c0_i32, %c0_i32_0 : i32, i32
  }
  func.func @transform_4(%arg0: i32) -> (i32, i32) {
    %c0_i32 = arith.constant 0 : i32
    %c0_i32_0 = arith.constant 0 : i32
    %c0_i32_1 = arith.constant 0 : i32
    return %c0_i32, %c0_i32_0 : i32, i32
  }
  func.func @transform_5(%arg0: i32) -> (i32, i32) {
    %c0_i32 = arith.constant 0 : i32
    %c0_i32_0 = arith.constant 0 : i32
    %c0_i32_1 = arith.constant 0 : i32
    return %c0_i32, %c0_i32_0 : i32, i32
  }
  func.func @transform_6(%arg0: i32) -> (i32, i32) {
    %c0_i32 = arith.constant 0 : i32
    %c0_i32_0 = arith.constant 0 : i32
    %c0_i32_1 = arith.constant 0 : i32
    return %c0_i32, %c0_i32_0 : i32, i32
  }
  func.func @transform_7(%arg0: i32) -> (i32, i32) {
    %c0_i32 = arith.constant 0 : i32
    %c0_i32_0 = arith.constant 0 : i32
    %c0_i32_1 = arith.constant 0 : i32
    return %c0_i32, %c0_i32_0 : i32, i32
  }
  func.func @transform_8(%arg0: i32) -> (i32, i32) {
    %c0_i32 = arith.constant 0 : i32
    %c0_i32_0 = arith.constant 0 : i32
    return %c0_i32, %arg0 : i32, i32
  }
  func.func @transform_9(%arg0: i32) -> (i32, i32) {
    %c0_i32 = arith.constant 0 : i32
    %c0_i32_0 = arith.constant 0 : i32
    %c0_i32_1 = arith.constant 0 : i32
    return %c0_i32, %c0_i32_0 : i32, i32
  }
  func.func @transform_10(%arg0: i32) -> (i32, i32) {
    %c0_i32 = arith.constant 0 : i32
    %c0_i32_0 = arith.constant 0 : i32
    return %c0_i32, %arg0 : i32, i32
  }
}

</mosaic_0001>

<bundles_post_ra>
// kernel: tpu_custom_call.1
= control target key start
LH: loop header
LB: loop body
LE: loop exit
PB: predicated region body
PF: predicated region fallthrough
CT: control target
= control target key end

     0   :  { %15 = vsyncpa [#allocation4], 0  ;;  %s1245_s0 = inlined_call_operand.vmem [shape: f32[32,256], index: 0, kind: input, shape index: {}]   ;;  %s1246_s1 = inlined_call_operand.vmem [shape: f32[32,96], index: 1, kind: input, shape index: {}]   ;;  %s1247_s2 = inlined_call_operand.vmem [shape: f32[32,1], index: 2, kind: input, shape index: {}]   ;;  %s1248_s3 = inlined_call_operand.vmem [shape: f32[32,1], index: 3, kind: input, shape index: {}]   ;;  %s1249_s4 = inlined_call_operand.vmem [shape: f32[32,1], index: 4, kind: input, shape index: {}]   ;;  %s1250_s5 = inlined_call_operand.vmem [shape: f32[32,96], index: 5, kind: input, shape index: {}]   ;;  %s1251_s6 = inlined_call_operand.vmem [shape: f32[32,1], index: 6, kind: input, shape index: {}]   ;;  %s1252_s7 = inlined_call_operand.vmem [shape: f32[32,1], index: 7, kind: input, shape index: {}]   ;;  %s1253_s8 = inlined_call_operand.vmem [shape: f32[1,256], index: 8, kind: input, shape index: {}]   ;;  %s1254_s9 = inlined_call_operand.vmem [shape: f32[1,2], index: 9, kind: input, shape index: {}]   ;;  %s1255_s10 = inlined_call_operand.hbm [shape: f32[1,256], index: 10, kind: output, shape index: {}]  }
   0x1   :  { %16 = vsyncpa [#allocation3], 0  ;;  %s40_s15 = sshll.u32 %s1254_s9, 4  ;;  %s859_s16 = smov [#allocation2]   ;;  %s41_s15 = int_to_ptr.vmem [resolvable:$true] %s40_s15 }
   0x2   :  { %43 = dma.vmem_to_smem %s41_s15, 16, %s859_s16, [#allocation4]  }
   0x3   :  { %855 = dma.done.wait [#allocation4], 16  }
   0x4   :  { %856 = vsyncadd [#allocation4], 4294967280 }
   0x5   :  { %48 = sfence }
   0x6   :  { %v925_v0 = vld [vmem:[%s1245_s0 + $0x30] sm:$0xff]  ;;  %v930_v1 = vld [vmem:[%s1245_s0 + $0x38] sm:$0xff]  ;;  %s860_s24 = smov 127   ;;  %s861_s25 = smov 1   ;;  %v53_v6 = vld [vmem:[%s1245_s0 + $0x20] sm:$0xff]  ;;  %v74_v12 = vlaneseq  ;;  %v862_v18 = vmov 0  }
   0x7   :  { %v935_v2 = vld [vmem:[%s1245_s0 + $0x10] sm:$0xff]  ;;  %v728_v3 = vpack.i.bf16 %v930_v1, %v925_v0  ;;  %v942_v4 = vld [vmem:[%s1245_s0 + $0x18] sm:$0xff]  ;;  %v54_v7 = vld [vmem:[%s1245_s0 + $0x28] sm:$0xff]  ;;  %770 = vset.pattern.permute.xlu1 %v862_v18  ;;  %769 = vset.pattern.permute.xlu0 %v862_v18  ;;  %vm138_vm2 = vcmask 785408   ;;  %s1238_s20 = sld [smem:[#allocation2]]  ;;  %s863_s21 = smov [#allocation5]  }
   0x8   :  { %v738_v5 = vpack.i.bf16 %v942_v4, %v935_v2  ;;  %v958_v8 = vld [vmem:[%s1245_s0] sm:$0xff]  ;;  %v963_v9 = vld [vmem:[%s1245_s0 + $0x8] sm:$0xff]  ;;  %v733_v10 = vpack.i.bf16 %v54_v7, %v53_v6  ;;  %v973_v13 = vand.u32 127, %v74_v12  ;;  %768 = vset.pattern.permute.xlu2 %v862_v18  ;;  %v116_v28 = vld [vmem:[%s1247_s2 + $0x10] sm:$0xff]  ;;  %s694_s22 = sshll.u32 %s863_s21, 4  ;;  %vm681_vm15 = vcmask 1040384   ;;  %s695_s22 = int_to_ptr.vmem [resolvable:$true] %s694_s22 }
   0x9   :  { %729 = vrot.lane.b32.xlu0 %v728_v3, %s860_s24  ;;  %749 = vrot.lane.b32.xlu2 %v728_v3, %s861_s25  ;;  %v743_v11 = vpack.i.bf16 %v963_v9, %v958_v8  ;;  %v115_v29 = vld [vmem:[%s1247_s2 + $0x8] sm:$0xff]  ;;  %v312_v38 = vld [vmem:[%s1248_s3 + $0x18] sm:$0xff] }
   0xa   :  { %739 = vrot.lane.b32.xlu1 %v738_v5, %s860_s24  ;;  %vm101_vm0 = vcmp.lt.s32.totalorder %v973_v13, 127  ;;  %v114_v39 = vld [vmem:[%s1247_s2] sm:$0xff]  ;;  %v344_v41 = vld [vmem:[%s1249_s4 + $0x18] sm:$0xff]  ;;  %vm76_vm1 = vcmp.lt.s32.totalorder %v973_v13, 1  ;;  %v310_v56 = vld [vmem:[%s1248_s3 + $0x8] sm:$0xff] }
   0xb   :  { %v117_v57 = vld [vmem:[%s1247_s2 + $0x18] sm:$0xff]  ;;  %v309_v58 = vld [vmem:[%s1248_s3] sm:$0xff]  ;;  %v343_v3 = vld [vmem:[%s1249_s4 + $0x10] sm:$0xff] }
   0xc   :  { %v110_v63 = vld [vmem:[%s1246_s1] sm:$0xff]  ;;  %v437_v13 = vld [vmem:[%s1250_s5 + $0x18] sm:$0xff] }
  0x11   :  { %734 = vrot.lane.b32.xlu0 %v733_v10, %s860_s24  ;;  %754 = vrot.lane.b32.xlu2 %v733_v10, %s861_s25 }
  0x12   :  { %744 = vrot.lane.b32.xlu1 %v743_v11, %s860_s24 }
  0x19   :  { %759 = vrot.lane.b32.xlu0 %v738_v5, %s861_s25  ;;  %120 = vperm.xlu2 %768, %v114_v39   ;;  %v341_v5 = vld [vmem:[%s1249_s4] sm:$0xff] }
  0x1a   :  { %764 = vrot.lane.b32.xlu1 %v743_v11, %s861_s25 }
  0x21   :  { %125 = vperm.xlu0 %769, %v115_v29   ;;  %135 = vperm.xlu2 %768, %v117_v57  }
  0x22   :  { %130 = vperm.xlu1 %770, %v116_v28  }
  0x29   :  { %362 = vperm.xlu0 %769, %v344_v41  }
  0x2a   :  { %330 = vperm.xlu1 %770, %v312_v38  }
  0x31   :  { %315 = vperm.xlu0 %769, %v309_v58  }
  0x32   :  { %320 = vperm.xlu1 %770, %v310_v56  }
  0x63   :  { %v750_v22 = vpop.permute.xlu2 %749 }
  0x64   :  { %v752_v42 = vunpack.i.h.bf16 %v750_v22  ;;  %v751_v43 = vunpack.i.l.bf16 %v750_v22 }
  0x66   :  { %v84_v50 = vsel %vm76_vm1, %v752_v42, %v751_v43  ;;  %v80_v51 = vsel %vm76_vm1, %v751_v43, %v752_v42 }
  0x6b   :  { %v755_v40 = vpop.permute.xlu2 %754 }
  0x6c   :  { %v757_v45 = vunpack.i.h.bf16 %v755_v40  ;;  %v756_v46 = vunpack.i.l.bf16 %v755_v40 }
  0x6e   :  { %v83_v54 = vsel %vm76_vm1, %v757_v45, %v756_v46  ;;  %v79_v55 = vsel %vm76_vm1, %v756_v46, %v757_v45 }
  0x73   :  { %v121_v11 = vpop.permute.xlu2 %120 }
  0x7b   :  { %v730_v14 = vpop.permute.xlu0 %729 }
  0x7c   :  { %v732_v15 = vunpack.i.h.bf16 %v730_v14  ;;  %v731_v16 = vunpack.i.l.bf16 %v730_v14  ;;  %v740_v17 = vpop.permute.xlu1 %739 }
  0x7d   :  { %v742_v23 = vunpack.i.h.bf16 %v740_v17  ;;  %v741_v24 = vunpack.i.l.bf16 %v740_v17 }
  0x7e   :  { %v105_v19 = vsel %vm101_vm0, %v731_v16, %v732_v15  ;;  %v109_v20 = vsel %vm101_vm0, %v732_v15, %v731_v16 }
  0x7f   :  { %155 = vmatpush.msra.mxu0 %v105_v19  ;;  %184 = vmatpush.msra.mxu1 %v109_v20  ;;  %v103_v34 = vsel %vm101_vm0, %v741_v24, %v742_v23  ;;  %v107_v35 = vsel %vm101_vm0, %v742_v23, %v741_v24 }
  0x83   :  { %v735_v21 = vpop.permute.xlu0 %734 }
  0x84   :  { %v737_v25 = vunpack.i.h.bf16 %v735_v21  ;;  %v736_v26 = vunpack.i.l.bf16 %v735_v21  ;;  %v745_v27 = vpop.permute.xlu1 %744 }
  0x85   :  { %v747_v30 = vunpack.i.h.bf16 %v745_v27  ;;  %v746_v31 = vunpack.i.l.bf16 %v745_v27 }
  0x86   :  { %v104_v32 = vsel %vm101_vm0, %v736_v26, %v737_v25  ;;  %v108_v33 = vsel %vm101_vm0, %v737_v25, %v736_v26 }
  0x87   :  { %156 = vmatpush.msra.mxu0 %v104_v32  ;;  %185 = vmatpush.msra.mxu1 %v108_v33  ;;  %v102_v36 = vsel %vm101_vm0, %v746_v31, %v747_v30  ;;  %v106_v37 = vsel %vm101_vm0, %v747_v30, %v746_v31  ;;  %v136_v32 = vpop.permute.xlu2 %135 }
  0x89   :  { %157 = vmatpush.msra.mxu0 %v103_v34  ;;  %186 = vmatpush.msra.mxu1 %v107_v35 }
  0x8b   :  { %158 = vmatpush.msra.mxu0 %v102_v36  ;;  %187 = vmatpush.msra.mxu1 %v106_v37  ;;  %v760_v44 = vpop.permute.xlu0 %759 }
  0x8c   :  { %v765_v47 = vpop.permute.xlu1 %764  ;;  %v762_v48 = vunpack.i.h.bf16 %v760_v44  ;;  %v761_v49 = vunpack.i.l.bf16 %v760_v44 }
  0x8d   :  { %159 = vmatpush.msra.mxu0 %v925_v0  ;;  %188 = vmatpush.msra.mxu1 %v930_v1  ;;  %v767_v52 = vunpack.i.h.bf16 %v765_v47  ;;  %v766_v53 = vunpack.i.l.bf16 %v765_v47  ;;  %v342_v0 = vld [vmem:[%s1249_s4 + $0x8] sm:$0xff]  ;;  %v311_v1 = vld [vmem:[%s1248_s3 + $0x10] sm:$0xff] }
  0x8e   :  { %v82_v59 = vsel %vm76_vm1, %v762_v48, %v761_v49  ;;  %v78_v60 = vsel %vm76_vm1, %v761_v49, %v762_v48  ;;  %352 = vperm.xlu1 %770, %v342_v0   ;;  %325 = vperm.xlu2 %768, %v311_v1  }
  0x8f   :  { %160 = vmatpush.msra.mxu0 %v53_v6  ;;  %189 = vmatpush.msra.mxu1 %v54_v7  ;;  %v81_v61 = vsel %vm76_vm1, %v767_v52, %v766_v53  ;;  %v77_v62 = vsel %vm76_vm1, %v766_v53, %v767_v52  ;;  %v113_v6 = vld [vmem:[%s1246_s1 + $0x18] sm:$0xff] }
  0x91   :  { %161 = vmatpush.msra.mxu0 %v935_v2  ;;  %190 = vmatpush.msra.mxu1 %v942_v4  ;;  %v111_v2 = vld [vmem:[%s1246_s1 + $0x8] sm:$0xff]  ;;  %v112_v4 = vld [vmem:[%s1246_s1 + $0x10] sm:$0xff] }
  0x93   :  { %162 = vmatpush.msra.mxu0 %v958_v8  ;;  %191 = vmatpush.msra.mxu1 %v963_v9  ;;  %v126_v14 = vpop.permute.xlu0 %125 }
  0x94   :  { %v131_v17 = vpop.permute.xlu1 %130 }
  0x95   :  { %163 = vmatpush.msra.mxu0 %v84_v50  ;;  %192 = vmatpush.msra.mxu1 %v80_v51 }
  0x96   :  { %357 = vperm.xlu2 %768, %v343_v3  }
  0x97   :  { %164 = vmatpush.msra.mxu0 %v83_v54  ;;  %193 = vmatpush.msra.mxu1 %v79_v55 }
  0x99   :  { %165 = vmatpush.msra.mxu0 %v82_v59  ;;  %194 = vmatpush.msra.mxu1 %v78_v60 }
  0x9b   :  { %166 = vmatpush.msra.mxu0 %v81_v61  ;;  %195 = vmatpush.msra.mxu1 %v77_v62 }
  0x9c   :  { %706 = vmatmul.msk.f32.vlgmr.msra.gmra.mxu0 %vm138_vm2, %v110_v63  ;;  %710 = vmatmul.msk.f32.vlgmr.msra.gmra.mxu1 %vm138_vm2, %v110_v63 }
  0x9e   :  { %347 = vperm.xlu2 %768, %v341_v5  }
  0xa4   :  { %707 = vmatmul.msk.f32.gmra.mxu0 %vm138_vm2, %v111_v2  ;;  %711 = vmatmul.msk.f32.gmra.mxu1 %vm138_vm2, %v111_v2 }
  0xac   :  { %708 = vmatmul.msk.f32.gmra.mxu0 %vm138_vm2, %v112_v4  ;;  %712 = vmatmul.msk.f32.gmra.mxu1 %vm138_vm2, %v112_v4 }
  0xb4   :  { %709 = vmatmul.msk.f32.gmra.mxu0 %vm138_vm2, %v113_v6  ;;  %713 = vmatmul.msk.f32.gmra.mxu1 %vm138_vm2, %v113_v6 }
 0x119   :  { %v168_v7 = vpop.f32.mrf.mxu0  ;;  %v197_v8 = vpop.f32.mrf.mxu1 }
 0x11a   :  { %v169_v18 = vadd.f32 %v168_v7, %v121_v11  ;;  %v198_v19 = vadd.f32 %v197_v8, %v121_v11 }
 0x11c   :  { %v1075_v26 = vmax.f32 %v169_v18, 0.0  ;;  %v1077_v27 = vmax.f32 %v198_v19, 0.0 }
 0x11e   :  { %v237_v33 = vmul.f32 %v1075_v26, %v1075_v26  ;;  %v238_v34 = vmul.f32 %v1077_v27, %v1077_v27 }
 0x121   :  { %v171_v9 = vpop.f32.mrf.mxu0  ;;  %v200_v10 = vpop.f32.mrf.mxu1 }
 0x122   :  { %v172_v15 = vadd.f32 %v171_v9, %v126_v14  ;;  %v201_v16 = vadd.f32 %v200_v10, %v126_v14 }
 0x124   :  { %v1071_v24 = vmax.f32 %v172_v15, 0.0  ;;  %v1073_v25 = vmax.f32 %v201_v16, 0.0 }
 0x126   :  { %v239_v30 = vmul.f32 %v1071_v24, %v1071_v24  ;;  %v240_v31 = vmul.f32 %v1073_v25, %v1073_v25  ;;  %v217_v39 = vadd.f32 %v1071_v24, %v1075_v26  ;;  %v226_v40 = vadd.f32 %v1073_v25, %v1077_v27 }
 0x128   :  { %v245_v43 = vadd.f32 %v239_v30, %v237_v33  ;;  %v254_v44 = vadd.f32 %v240_v31, %v238_v34 }
 0x129   :  { %v174_v20 = vpop.f32.mrf.mxu0  ;;  %v203_v21 = vpop.f32.mrf.mxu1 }
 0x12a   :  { %v175_v22 = vadd.f32 %v174_v20, %v131_v17  ;;  %v204_v23 = vadd.f32 %v203_v21, %v131_v17 }
 0x12c   :  { %v1079_v28 = vmax.f32 %v175_v22, 0.0  ;;  %v1081_v29 = vmax.f32 %v204_v23, 0.0 }
 0x12e   :  { %v241_v35 = vmul.f32 %v1079_v28, %v1079_v28  ;;  %v242_v36 = vmul.f32 %v1081_v29, %v1081_v29  ;;  %v218_v45 = vadd.f32 %v217_v39, %v1079_v28  ;;  %v227_v46 = vadd.f32 %v226_v40, %v1081_v29 }
 0x130   :  { %v246_v49 = vadd.f32 %v245_v43, %v241_v35  ;;  %v255_v50 = vadd.f32 %v254_v44, %v242_v36 }
 0x131   :  { %v177_v37 = vpop.f32.mrf.mxu0  ;;  %v206_v38 = vpop.f32.mrf.mxu1 }
 0x132   :  { %v178_v41 = vadd.f32 %v177_v37, %v136_v32  ;;  %v207_v42 = vadd.f32 %v206_v38, %v136_v32  ;;  %v331_v37 = vpop.permute.xlu1 %330  ;;  %v326_v38 = vpop.permute.xlu2 %325 }
 0x134   :  { %v1101_v47 = vmax.f32 %v178_v41, 0.0  ;;  %v1103_v48 = vmax.f32 %v207_v42, 0.0 }
 0x136   :  { %v219_v51 = vadd.f32 %v218_v45, %v1101_v47  ;;  %v243_v52 = vmul.f32 %v1101_v47, %v1101_v47  ;;  %v228_v53 = vadd.f32 %v227_v46, %v1103_v48  ;;  %v244_v54 = vmul.f32 %v1103_v48, %v1103_v48  ;;  %v363_v45 = vpop.permute.xlu0 %362 }
 0x138   :  { %v220_v55 = vrot.slane %v219_v51, 4  ;;  %v247_v56 = vadd.f32 %v246_v49, %v243_v52  ;;  %v229_v57 = vrot.slane %v228_v53, 4  ;;  %v256_v58 = vadd.f32 %v255_v50, %v244_v54  ;;  %v57_v50 = vld [vmem:[%s1253_s8] sm:$0x3]  ;;  %s696_s8 = sshll.u32 %s1255_s10, 4  ;;  %s697_s8 = int_to_ptr.hbm [resolvable:$true] %s696_s8 }
 0x13a   :  { %v221_v59 = vadd.f32 %v220_v55, %v219_v51  ;;  %v248_v60 = vrot.slane %v247_v56, 4  ;;  %v230_v61 = vadd.f32 %v229_v57, %v228_v53  ;;  %v257_v62 = vrot.slane %v256_v58, 4  ;;  %v321_v46 = vpop.permute.xlu1 %320 }
 0x13b   :  { %v374_v55 = vperm.slane %v57_v50, 0 }
 0x13c   :  { %v222_v63 = vrot.slane %v221_v59, 2  ;;  %v249_v0 = vadd.f32 %v248_v60, %v247_v56  ;;  %v231_v1 = vrot.slane %v230_v61, 2  ;;  %v258_v2 = vadd.f32 %v257_v62, %v256_v58  ;;  %v358_v56 = vpop.permute.xlu2 %357 }
 0x13e   :  { %v223_v3 = vadd.f32 %v222_v63, %v221_v59  ;;  %v250_v4 = vrot.slane %v249_v0, 2  ;;  %v232_v5 = vadd.f32 %v231_v1, %v230_v61  ;;  %v259_v6 = vrot.slane %v258_v2, 2 }
 0x140   :  { %v224_v7 = vrot.slane %v223_v3, 1  ;;  %v251_v8 = vadd.f32 %v250_v4, %v249_v0  ;;  %v233_v9 = vrot.slane %v232_v5, 1  ;;  %v260_v10 = vadd.f32 %v259_v6, %v258_v2 }
 0x142   :  { %v225_v11 = vadd.f32 %v224_v7, %v223_v3  ;;  %v252_v14 = vrot.slane %v251_v8, 1  ;;  %v234_v15 = vadd.f32 %v233_v9, %v232_v5  ;;  %v261_v16 = vrot.slane %v260_v10, 1 }
 0x144   :  { %v235_v17 = vmul.f32 0.03125, %v225_v11  ;;  %v253_v18 = vadd.f32 %v252_v14, %v251_v8  ;;  %v236_v19 = vmul.f32 0.03125, %v234_v15  ;;  %v262_v20 = vadd.f32 %v261_v16, %v260_v10  ;;  %v316_v10 = vpop.permute.xlu0 %315  ;;  %v353_v11 = vpop.permute.xlu1 %352 }
 0x146   :  { %v263_v21 = vmul.f32 0.03125, %v253_v18  ;;  %v265_v22 = vmul.f32 %v235_v17, %v235_v17  ;;  %v264_v23 = vmul.f32 0.03125, %v262_v20  ;;  %v266_v30 = vmul.f32 %v236_v19, %v236_v19 }
 0x147   :  { %v277_v53 = vsub.f32 %v1101_v47, %v235_v17  ;;  %v278_v58 = vsub.f32 %v1103_v48, %v236_v19  ;;  %v275_v59 = vsub.f32 %v1079_v28, %v235_v17  ;;  %v276_v61 = vsub.f32 %v1081_v29, %v236_v19 }
 0x148   :  { %v267_v31 = vsub.f32 %v263_v21, %v265_v22  ;;  %v268_v32 = vsub.f32 %v264_v23, %v266_v30  ;;  %v273_v62 = vsub.f32 %v1071_v24, %v235_v17  ;;  %v274_v47 = vsub.f32 %v1073_v25, %v236_v19 }
 0x149   :  { %v271_v0 = vsub.f32 %v1075_v26, %v235_v17  ;;  %v272_v1 = vsub.f32 %v1077_v27, %v236_v19  ;;  %v375_v25 = vperm.slane %v57_v50, 1  ;;  %v617_v50 = vld [vmem:[%s1252_s7 + $0x8] sm:$0xff] }
 0x14a   :  { %v269_v33 = vmax.f32 %v267_v31, 0.0  ;;  %v270_v34 = vmax.f32 %v268_v32, 0.0  ;;  %v348_v32 = vpop.permute.xlu2 %347 }
 0x14c   :  { %v279_v35 = vadd.f32 1e-05, %v269_v33  ;;  %v280_v36 = vadd.f32 1e-05, %v270_v34 }
 0x14e   :  { %811 = vrsqrt.f32 %v279_v35  ;;  %vm287_vm5 = vweird.f32 %v279_v35  ;;  %vm297_vm7 = vweird.f32 %v280_v36 }
 0x14f   :  { %813 = vrsqrt.f32 %v280_v36 }
 0x154   :  { %v812_v39 = vpop.eup %811 }
 0x155   :  { %v814_v40 = vpop.eup %813  ;;  %v282_v41 = vmul.f32 %v812_v39, %v279_v35  ;;  %vm288_vm3 = vweird.f32 %v812_v39 }
 0x156   :  { %v292_v42 = vmul.f32 %v814_v40, %v280_v36  ;;  %vm298_vm4 = vweird.f32 %v814_v40  ;;  %vm289_vm6 = vmor %vm287_vm5, %vm288_vm3 }
 0x157   :  { %v283_v43 = vmul.f32 %v812_v39, %v282_v41  ;;  %vm299_vm8 = vmor %vm297_vm7, %vm298_vm4 }
 0x158   :  { %v293_v44 = vmul.f32 %v814_v40, %v292_v42 }
 0x159   :  { %v284_v49 = vmul.f32 0.5, %v283_v43 }
 0x15a   :  { %v294_v51 = vmul.f32 0.5, %v293_v44  ;;  %v438_v44 = vld [vmem:[%s1251_s6] sm:$0xff] }
 0x15b   :  { %v285_v52 = vsub.f32 1.5, %v284_v49  ;;  %v441_v49 = vld [vmem:[%s1251_s6 + $0x18] sm:$0xff] }
 0x15c   :  { %v295_v54 = vsub.f32 1.5, %v294_v51  ;;  %v616_v51 = vld [vmem:[%s1252_s7] sm:$0xff] }
 0x15d   :  { %v286_v57 = vmul.f32 %v812_v39, %v285_v52  ;;  %v618_v52 = vld [vmem:[%s1252_s7 + $0x10] sm:$0xff] }
 0x15e   :  { %v296_v60 = vmul.f32 %v814_v40, %v295_v54 }
 0x15f   :  { %v290_v63 = vsel %vm289_vm6, %v812_v39, %v286_v57 }
 0x160   :  { %v307_v2 = vmul.f32 %v290_v63, %v277_v53  ;;  %v300_v3 = vsel %vm299_vm8, %v814_v40, %v296_v60  ;;  %v305_v48 = vmul.f32 %v290_v63, %v275_v59  ;;  %v303_v4 = vmul.f32 %v290_v63, %v273_v62  ;;  %v619_v53 = vld [vmem:[%s1252_s7 + $0x18] sm:$0xff] }
 0x161   :  { %v308_v28 = vmul.f32 %v300_v3, %v278_v58  ;;  %v306_v5 = vmul.f32 %v300_v3, %v276_v61  ;;  %v304_v6 = vmul.f32 %v300_v3, %v274_v47  ;;  %v301_v7 = vmul.f32 %v290_v63, %v271_v0 }
 0x162   :  { %v339_v8 = vmul.f32 %v331_v37, %v307_v2  ;;  %v337_v29 = vmul.f32 %v326_v38, %v305_v48  ;;  %v335_v9 = vmul.f32 %v321_v46, %v303_v4  ;;  %v302_v24 = vmul.f32 %v300_v3, %v272_v1 }
 0x163   :  { %v340_v14 = vmul.f32 %v331_v37, %v308_v28  ;;  %v338_v15 = vmul.f32 %v326_v38, %v306_v5  ;;  %v336_v26 = vmul.f32 %v321_v46, %v304_v6  ;;  %v333_v18 = vmul.f32 %v316_v10, %v301_v7  ;;  %v439_v46 = vld [vmem:[%s1251_s6 + $0x8] sm:$0xff] }
 0x164   :  { %v371_v16 = vadd.f32 %v363_v45, %v339_v8  ;;  %v369_v27 = vadd.f32 %v358_v56, %v337_v29  ;;  %v367_v17 = vadd.f32 %v353_v11, %v335_v9  ;;  %v334_v22 = vmul.f32 %v316_v10, %v302_v24 }
 0x165   :  { %v372_v19 = vadd.f32 %v363_v45, %v340_v14  ;;  %v370_v20 = vadd.f32 %v358_v56, %v338_v15  ;;  %v368_v21 = vadd.f32 %v353_v11, %v336_v26  ;;  %v365_v36 = vadd.f32 %v348_v32, %v333_v18  ;;  %v440_v45 = vld [vmem:[%s1251_s6 + $0x10] sm:$0xff] }
 0x166   :  { %v1122_v23 = vmul.f32 %v374_v55, %v371_v16  ;;  %v1124_v30 = vmul.f32 %v374_v55, %v369_v27  ;;  %v1126_v31 = vmul.f32 %v374_v55, %v367_v17  ;;  %v366_v40 = vadd.f32 %v348_v32, %v334_v22  ;;  %v434_v22 = vld [vmem:[%s1250_s5] sm:$0xff]  ;;  %v436_v32 = vld [vmem:[%s1250_s5 + $0x10] sm:$0xff] }
 0x167   :  { %v1128_v33 = vmul.f32 %v375_v25, %v372_v19  ;;  %v1130_v34 = vmul.f32 %v375_v25, %v370_v20  ;;  %v1132_v35 = vmul.f32 %v375_v25, %v368_v21  ;;  %v1143_v41 = vmul.f32 %v374_v55, %v365_v36 }
 0x168   :  { %v1145_v42 = vmul.f32 %v375_v25, %v366_v40 }
 0x169   :  { %v771_v37 = vpack.i.bf16 %v1128_v33, %v1122_v23  ;;  %v776_v38 = vpack.i.bf16 %v1130_v34, %v1124_v30  ;;  %v781_v39 = vpack.i.bf16 %v1132_v35, %v1126_v31 }
 0x16a   :  { %v786_v43 = vpack.i.bf16 %v1145_v42, %v1143_v41 }
 0x16b   :  { %772 = vrot.lane.b32.xlu0 %v771_v37, %s860_s24  ;;  %777 = vrot.lane.b32.xlu1 %v776_v38, %s860_s24 }
 0x16c   :  { %782 = vrot.lane.b32.xlu2 %v781_v39, %s860_s24 }
 0x173   :  { %792 = vrot.lane.b32.xlu1 %v771_v37, %s861_s25  ;;  %787 = vrot.lane.b32.xlu0 %v786_v43, %s860_s24 }
 0x174   :  { %797 = vrot.lane.b32.xlu2 %v776_v38, %s861_s25 }
 0x17b   :  { %807 = vrot.lane.b32.xlu1 %v786_v43, %s861_s25  ;;  %802 = vrot.lane.b32.xlu0 %v781_v39, %s861_s25 }
 0x17c   :  { %444 = vperm.xlu2 %768, %v438_v44  }
 0x183   :  { %454 = vperm.xlu1 %770, %v440_v45   ;;  %449 = vperm.xlu0 %769, %v439_v46  }
 0x184   :  { %459 = vperm.xlu2 %768, %v441_v49  }
 0x18b   :  { %627 = vperm.xlu1 %770, %v617_v50   ;;  %622 = vperm.xlu0 %769, %v616_v51  }
 0x18c   :  { %632 = vperm.xlu2 %768, %v618_v52  }
 0x193   :  { %637 = vperm.xlu0 %769, %v619_v53  }
 0x1c6   :  { %v783_v54 = vpop.permute.xlu2 %782 }
 0x1c7   :  { %v785_v61 = vunpack.i.h.bf16 %v783_v54  ;;  %v784_v62 = vunpack.i.l.bf16 %v783_v54 }
 0x1c9   :  { %v427_v2 = vsel %vm101_vm0, %v784_v62, %v785_v61  ;;  %v431_v3 = vsel %vm101_vm0, %v785_v61, %v784_v62 }
 0x1ce   :  { %v798_v8 = vpop.permute.xlu2 %797 }
 0x1cf   :  { %v800_v10 = vunpack.i.h.bf16 %v798_v8  ;;  %v799_v11 = vunpack.i.l.bf16 %v798_v8 }
 0x1d1   :  { %v408_v18 = vsel %vm76_vm1, %v800_v10, %v799_v11  ;;  %v404_v19 = vsel %vm76_vm1, %v799_v11, %v800_v10 }
 0x1d6   :  { %v445_v37 = vpop.permute.xlu2 %444 }
 0x1dd   :  { %v773_v55 = vpop.permute.xlu0 %772  ;;  %v778_v56 = vpop.permute.xlu1 %777 }
 0x1de   :  { %v775_v57 = vunpack.i.h.bf16 %v773_v55  ;;  %v774_v58 = vunpack.i.l.bf16 %v773_v55  ;;  %v780_v59 = vunpack.i.h.bf16 %v778_v56  ;;  %v779_v60 = vunpack.i.l.bf16 %v778_v56 }
 0x1e0   :  { %v429_v63 = vsel %vm101_vm0, %v774_v58, %v775_v57  ;;  %v433_v47 = vsel %vm101_vm0, %v775_v57, %v774_v58  ;;  %v428_v0 = vsel %vm101_vm0, %v779_v60, %v780_v59  ;;  %v432_v1 = vsel %vm101_vm0, %v780_v59, %v779_v60  ;;  %v460_v57 = vpop.permute.xlu2 %459 }
 0x1e1   :  { %478 = vmatpush.msra.mxu2 %v429_v63  ;;  %507 = vmatpush.msra.mxu3 %v433_v47 }
 0x1e3   :  { %479 = vmatpush.msra.mxu2 %v428_v0  ;;  %508 = vmatpush.msra.mxu3 %v432_v1 }
 0x1e5   :  { %480 = vmatpush.msra.mxu2 %v427_v2  ;;  %509 = vmatpush.msra.mxu3 %v431_v3  ;;  %v788_v48 = vpop.permute.xlu0 %787  ;;  %v793_v5 = vpop.permute.xlu1 %792 }
 0x1e6   :  { %v790_v4 = vunpack.i.h.bf16 %v788_v48  ;;  %v789_v28 = vunpack.i.l.bf16 %v788_v48  ;;  %v795_v29 = vunpack.i.h.bf16 %v793_v5  ;;  %v794_v9 = vunpack.i.l.bf16 %v793_v5 }
 0x1e8   :  { %v426_v6 = vsel %vm101_vm0, %v789_v28, %v790_v4  ;;  %v430_v7 = vsel %vm101_vm0, %v790_v4, %v789_v28  ;;  %v409_v26 = vsel %vm76_vm1, %v795_v29, %v794_v9  ;;  %v405_v16 = vsel %vm76_vm1, %v794_v9, %v795_v29 }
 0x1e9   :  { %481 = vmatpush.msra.mxu2 %v426_v6  ;;  %510 = vmatpush.msra.mxu3 %v430_v7  ;;  %vm686_vm0 = vcmp.lt.s32.totalorder %v74_v12, 256 }
 0x1eb   :  { %482 = vmatpush.msra.mxu2 %v1122_v23  ;;  %511 = vmatpush.msra.mxu3 %v1128_v33 }
 0x1ed   :  { %483 = vmatpush.msra.mxu2 %v1124_v30  ;;  %512 = vmatpush.msra.mxu3 %v1130_v34  ;;  %v803_v24 = vpop.permute.xlu0 %802  ;;  %v808_v14 = vpop.permute.xlu1 %807 }
 0x1ee   :  { %v805_v25 = vunpack.i.h.bf16 %v803_v24  ;;  %v804_v15 = vunpack.i.l.bf16 %v803_v24  ;;  %v810_v27 = vunpack.i.h.bf16 %v808_v14  ;;  %v809_v17 = vunpack.i.l.bf16 %v808_v14 }
 0x1ef   :  { %484 = vmatpush.msra.mxu2 %v1126_v31  ;;  %513 = vmatpush.msra.mxu3 %v1132_v35  ;;  %v435_v31 = vld [vmem:[%s1250_s5 + $0x8] sm:$0xff]  ;;  %s722_s5 = sld [smem:[#allocation2 + $0x1]] }
 0x1f0   :  { %v407_v20 = vsel %vm76_vm1, %v805_v25, %v804_v15  ;;  %v403_v21 = vsel %vm76_vm1, %v804_v15, %v805_v25  ;;  %v406_v23 = vsel %vm76_vm1, %v810_v27, %v809_v17  ;;  %v402_v30 = vsel %vm76_vm1, %v809_v17, %v810_v27 }
 0x1f1   :  { %485 = vmatpush.msra.mxu2 %v1143_v41  ;;  %514 = vmatpush.msra.mxu3 %v1145_v42 }
 0x1f3   :  { %486 = vmatpush.msra.mxu2 %v409_v26  ;;  %515 = vmatpush.msra.mxu3 %v405_v16 }
 0x1f5   :  { %487 = vmatpush.msra.mxu2 %v408_v18  ;;  %516 = vmatpush.msra.mxu3 %v404_v19  ;;  %v450_v38 = vpop.permute.xlu0 %449  ;;  %v455_v40 = vpop.permute.xlu1 %454 }
 0x1f7   :  { %488 = vmatpush.msra.mxu2 %v407_v20  ;;  %517 = vmatpush.msra.mxu3 %v403_v21 }
 0x1f9   :  { %489 = vmatpush.msra.mxu2 %v406_v23  ;;  %518 = vmatpush.msra.mxu3 %v402_v30 }
 0x1fa   :  { %714 = vmatmul.msk.f32.vlgmr.msra.gmra.mxu2 %vm138_vm2, %v434_v22  ;;  %718 = vmatmul.msk.f32.vlgmr.msra.gmra.mxu3 %vm138_vm2, %v434_v22 }
 0x1fd   :  { %v623_v8 = vpop.permute.xlu0 %622  ;;  %v628_v19 = vpop.permute.xlu1 %627 }
 0x202   :  { %715 = vmatmul.msk.f32.gmra.mxu2 %vm138_vm2, %v435_v31  ;;  %719 = vmatmul.msk.f32.gmra.mxu3 %vm138_vm2, %v435_v31 }
 0x20a   :  { %716 = vmatmul.msk.f32.gmra.mxu2 %vm138_vm2, %v436_v32  ;;  %720 = vmatmul.msk.f32.gmra.mxu3 %vm138_vm2, %v436_v32 }
 0x212   :  { %717 = vmatmul.msk.f32.gmra.mxu2 %vm138_vm2, %v437_v13  ;;  %721 = vmatmul.msk.f32.gmra.mxu3 %vm138_vm2, %v437_v13  ;;  %v633_v13 = vpop.permute.xlu2 %632 }
 0x27d   :  { %v491_v33 = vpop.f32.mrf.mxu2  ;;  %v520_v34 = vpop.f32.mrf.mxu3 }
 0x27e   :  { %v492_v41 = vadd.f32 %v491_v33, %v445_v37  ;;  %v521_v46 = vadd.f32 %v520_v34, %v445_v37 }
 0x280   :  { %v532_v51 = vmax.f32 %v492_v41, 0.0  ;;  %v533_v54 = vmax.f32 %v521_v46, 0.0  ;;  %v638_v41 = vpop.permute.xlu0 %637 }
 0x282   :  { %v560_v58 = vmul.f32 %v532_v51, %v532_v51  ;;  %v561_v2 = vmul.f32 %v533_v54, %v533_v54  ;;  %v640_v33 = vmul.f32 %v623_v8, %v532_v51  ;;  %v641_v37 = vmul.f32 %v623_v8, %v533_v54 }
 0x285   :  { %v494_v35 = vpop.f32.mrf.mxu2  ;;  %v523_v36 = vpop.f32.mrf.mxu3 }
 0x286   :  { %v495_v39 = vadd.f32 %v494_v35, %v450_v38  ;;  %v524_v42 = vadd.f32 %v523_v36, %v450_v38 }
 0x288   :  { %v534_v49 = vmax.f32 %v495_v39, 0.0  ;;  %v535_v52 = vmax.f32 %v524_v42, 0.0 }
 0x28a   :  { %v562_v55 = vmul.f32 %v534_v49, %v534_v49  ;;  %v540_v59 = vadd.f32 %v534_v49, %v532_v51  ;;  %v563_v60 = vmul.f32 %v535_v52, %v535_v52  ;;  %v549_v63 = vadd.f32 %v535_v52, %v533_v54 }
 0x28b   :  { %v642_v21 = vmul.f32 %v628_v19, %v534_v49  ;;  %v643_v31 = vmul.f32 %v628_v19, %v535_v52 }
 0x28c   :  { %v568_v3 = vadd.f32 %v562_v55, %v560_v58  ;;  %v577_v7 = vadd.f32 %v563_v60, %v561_v2 }
 0x28d   :  { %v497_v43 = vpop.f32.mrf.mxu2  ;;  %v526_v44 = vpop.f32.mrf.mxu3  ;;  %v648_v42 = vadd.f32 %v642_v21, %v640_v33  ;;  %v657_v46 = vadd.f32 %v643_v31, %v641_v37 }
 0x28e   :  { %v498_v45 = vadd.f32 %v497_v43, %v455_v40  ;;  %v527_v50 = vadd.f32 %v526_v44, %v455_v40 }
 0x290   :  { %v536_v53 = vmax.f32 %v498_v45, 0.0  ;;  %v537_v56 = vmax.f32 %v527_v50, 0.0 }
 0x292   :  { %v564_v47 = vmul.f32 %v536_v53, %v536_v53  ;;  %v565_v48 = vmul.f32 %v537_v56, %v537_v56  ;;  %v541_v4 = vadd.f32 %v540_v59, %v536_v53  ;;  %v550_v28 = vadd.f32 %v549_v63, %v537_v56 }
 0x293   :  { %v644_v38 = vmul.f32 %v633_v13, %v536_v53  ;;  %v645_v39 = vmul.f32 %v633_v13, %v537_v56 }
 0x294   :  { %v569_v29 = vadd.f32 %v568_v3, %v564_v47  ;;  %v578_v11 = vadd.f32 %v577_v7, %v565_v48 }
 0x295   :  { %v500_v61 = vpop.f32.mrf.mxu2  ;;  %v529_v62 = vpop.f32.mrf.mxu3  ;;  %v649_v51 = vadd.f32 %v648_v42, %v644_v38  ;;  %v658_v59 = vadd.f32 %v657_v46, %v645_v39 }
 0x296   :  { %v501_v0 = vadd.f32 %v500_v61, %v460_v57  ;;  %v530_v1 = vadd.f32 %v529_v62, %v460_v57 }
 0x298   :  { %v538_v5 = vmax.f32 %v501_v0, 0.0  ;;  %v539_v6 = vmax.f32 %v530_v1, 0.0 }
 0x29a   :  { %v542_v9 = vadd.f32 %v541_v4, %v538_v5  ;;  %v566_v24 = vmul.f32 %v538_v5, %v538_v5  ;;  %v551_v10 = vadd.f32 %v550_v28, %v539_v6  ;;  %v567_v14 = vmul.f32 %v539_v6, %v539_v6 }
 0x29b   :  { %v646_v49 = vmul.f32 %v638_v41, %v538_v5  ;;  %v647_v55 = vmul.f32 %v638_v41, %v539_v6 }
 0x29c   :  { %v543_v25 = vrot.slane %v542_v9, 4  ;;  %v570_v15 = vadd.f32 %v569_v29, %v566_v24  ;;  %v552_v26 = vrot.slane %v551_v10, 4  ;;  %v579_v16 = vadd.f32 %v578_v11, %v567_v14 }
 0x29d   :  { %v650_v56 = vadd.f32 %v649_v51, %v646_v49  ;;  %v659_v63 = vadd.f32 %v658_v59, %v647_v55 }
 0x29e   :  { %v544_v27 = vadd.f32 %v543_v25, %v542_v9  ;;  %v571_v17 = vrot.slane %v570_v15, 4  ;;  %v553_v18 = vadd.f32 %v552_v26, %v551_v10  ;;  %v580_v20 = vrot.slane %v579_v16, 4 }
 0x29f   :  { %v651_v48 = vrot.slane %v650_v56, 4  ;;  %v660_v28 = vrot.slane %v659_v63, 4 }
 0x2a0   :  { %v545_v22 = vrot.slane %v544_v27, 2  ;;  %v572_v23 = vadd.f32 %v571_v17, %v570_v15  ;;  %v554_v30 = vrot.slane %v553_v18, 2  ;;  %v581_v32 = vadd.f32 %v580_v20, %v579_v16 }
 0x2a1   :  { %v652_v8 = vadd.f32 %v651_v48, %v650_v56  ;;  %v661_v9 = vadd.f32 %v660_v28, %v659_v63 }
 0x2a2   :  { %v546_v34 = vadd.f32 %v545_v22, %v544_v27  ;;  %v573_v35 = vrot.slane %v572_v23, 2  ;;  %v555_v36 = vadd.f32 %v554_v30, %v553_v18  ;;  %v582_v40 = vrot.slane %v581_v32, 2 }
 0x2a3   :  { %v653_v24 = vrot.slane %v652_v8, 2  ;;  %v662_v10 = vrot.slane %v661_v9, 2  ;;  %v667_v18 = vstv %s722_s5 }
 0x2a4   :  { %v547_v43 = vrot.slane %v546_v34, 1  ;;  %v574_v44 = vadd.f32 %v573_v35, %v572_v23  ;;  %v556_v45 = vrot.slane %v555_v36, 1  ;;  %v583_v50 = vadd.f32 %v582_v40, %v581_v32 }
 0x2a5   :  { %v654_v25 = vadd.f32 %v653_v24, %v652_v8  ;;  %v663_v15 = vadd.f32 %v662_v10, %v661_v9  ;;  %v675_v40 = vstv %s1238_s20 }
 0x2a6   :  { %v548_v52 = vadd.f32 %v547_v43, %v546_v34  ;;  %v575_v57 = vrot.slane %v574_v44, 1  ;;  %v557_v58 = vadd.f32 %v556_v45, %v555_v36  ;;  %v584_v60 = vrot.slane %v583_v50, 1 }
 0x2a7   :  { %v655_v19 = vrot.slane %v654_v25, 1  ;;  %v664_v20 = vrot.slane %v663_v15, 1 }
 0x2a8   :  { %v558_v61 = vmul.f32 0.03125, %v548_v52  ;;  %v576_v54 = vadd.f32 %v575_v57, %v574_v44  ;;  %v559_v53 = vmul.f32 0.03125, %v557_v58  ;;  %v585_v62 = vadd.f32 %v584_v60, %v583_v50 }
 0x2a9   :  { %v665_v13 = vadd.f32 %v664_v20, %v663_v15  ;;  %v656_v34 = vadd.f32 %v655_v19, %v654_v25 }
 0x2aa   :  { %v586_v47 = vmul.f32 0.03125, %v576_v54  ;;  %v588_v0 = vmul.f32 %v558_v61, %v558_v61  ;;  %v589_v1 = vmul.f32 %v559_v53, %v559_v53  ;;  %v587_v2 = vmul.f32 0.03125, %v585_v62 }
 0x2ab   :  { %v668_v30 = vmul.f32 %v667_v18, %v558_v61  ;;  %v669_v31 = vmul.f32 %v667_v18, %v559_v53 }
 0x2ac   :  { %v590_v3 = vsub.f32 %v586_v47, %v588_v0  ;;  %v591_v4 = vsub.f32 %v587_v2, %v589_v1 }
 0x2ad   :  { %v670_v37 = vsub.f32 %v656_v34, %v668_v30  ;;  %v671_v38 = vsub.f32 %v665_v13, %v669_v31 }
 0x2ae   :  { %v592_v5 = vmax.f32 %v590_v3, 0.0  ;;  %v593_v6 = vmax.f32 %v591_v4, 0.0 }
 0x2b0   :  { %v594_v7 = vadd.f32 1e-05, %v592_v5  ;;  %v595_v29 = vadd.f32 1e-05, %v593_v6 }
 0x2b2   :  { %815 = vrsqrt.f32 %v594_v7  ;;  %vm602_vm11 = vweird.f32 %v594_v7  ;;  %vm612_vm13 = vweird.f32 %v595_v29 }
 0x2b3   :  { %817 = vrsqrt.f32 %v595_v29 }
 0x2b8   :  { %v816_v11 = vpop.eup %815 }
 0x2b9   :  { %v818_v14 = vpop.eup %817  ;;  %v597_v26 = vmul.f32 %v816_v11, %v594_v7  ;;  %vm603_vm9 = vweird.f32 %v816_v11 }
 0x2ba   :  { %v607_v16 = vmul.f32 %v818_v14, %v595_v29  ;;  %vm613_vm10 = vweird.f32 %v818_v14  ;;  %vm604_vm12 = vmor %vm602_vm11, %vm603_vm9 }
 0x2bb   :  { %v598_v27 = vmul.f32 %v816_v11, %v597_v26  ;;  %vm614_vm14 = vmor %vm612_vm13, %vm613_vm10 }
 0x2bc   :  { %v608_v17 = vmul.f32 %v818_v14, %v607_v16 }
 0x2bd   :  { %v599_v21 = vmul.f32 0.5, %v598_v27 }
 0x2be   :  { %v609_v22 = vmul.f32 0.5, %v608_v17 }
 0x2bf   :  { %v600_v23 = vsub.f32 1.5, %v599_v21 }
 0x2c0   :  { %v610_v32 = vsub.f32 1.5, %v609_v22 }
 0x2c1   :  { %v601_v33 = vmul.f32 %v816_v11, %v600_v23 }
 0x2c2   :  { %v611_v35 = vmul.f32 %v818_v14, %v610_v32 }
 0x2c3   :  { %v605_v36 = vsel %vm604_vm12, %v816_v11, %v601_v33 }
 0x2c4   :  { %v615_v39 = vsel %vm614_vm14, %v818_v14, %v611_v35  ;;  %v672_v41 = vmul.f32 %v670_v37, %v605_v36 }
 0x2c5   :  { %v673_v42 = vmul.f32 %v671_v38, %v615_v39 }
 0x2c6   :  { %v676_v44 = vadd.f32 %v675_v40, %v672_v41 }
 0x2c7   :  { %v677_v43 = vadd.f32 %v675_v40, %v673_v42 }
 0x2c9   :  { %v680_v45 = vrot.slane %v677_v43, 7 }
 0x2cb   :  { %v682_v46 = vsel %vm681_vm15, %v676_v44, %v680_v45 }
 0x2cc   :  { %688 = vst.msk [vmem:[#allocation5] sm:$0x3] %vm686_vm0, %v682_v46 }
 0x2cd   :  { %699 = dma.vmem_to_hbm [thread:$0]  %s695_s22, 32, %s697_s8, [#allocation3]  }
 0x2ce   :  { %857 = dma.done.wait [#allocation3], 32  }
 0x2cf   :  { %858 = vsyncadd [#allocation3], 4294967264 }
 0x2d0   :  { %704 = vsyncpa [#allocation3], 1 }
 0x2d1   :  { %705 = vsyncpa [#allocation4], 1 }

</bundles_post_ra>
